<compile_context>
chip_gen: v6e
topology: v6e:2x2x1
jax: 0.10.0
libtpu: 0.0.40
codegen_flags: <defaults>
</compile_context>

<pallas_src>
import functools

import jax
import jax.numpy as jnp
from jax.experimental import pallas as pl
from jax.experimental.pallas import tpu as pltpu


def _round_up(x, m):
    return (x + m - 1) // m * m


def _pick_tm(batch, cap=256):
    """Batch tile: 16-aligned (bf16 sublane packing), sized to minimize padding
    waste while amortizing the ~0.35us per-grid-step overhead."""
    batch = max(int(batch), 1)
    if batch <= cap:
        return _round_up(batch, 16)
    # Large batch: pick the 16-aligned tile in [128, cap] with the least
    # padding waste; prefer larger tiles on ties (matches the 256-wide MXU M).
    candidates = list(range(cap, 127, -16))
    return min(candidates, key=lambda t: (_round_up(batch, t) - batch, cap - t))


def _resident_spec(shape):
    """Grid-invariant (weights/biases) BlockSpec: constant index_map, and
    single-buffered since the block never changes across grid steps."""
    index_map = lambda i: (0, 0)
    try:
        return pl.BlockSpec(shape, index_map, pipeline_mode=pl.Buffered(1))
    except (TypeError, AttributeError):
        # Older API without pipeline_mode: fall back to default buffering.
        return pl.BlockSpec(shape, index_map)


# ---------------------------------------------------------------------------
# Fused MLP kernel: all layers in one kernel, activations never leave VMEM.
# refs = (x_ref, w0_ref, b0_ref, w1_ref, b1_ref, ..., o_ref)
# ---------------------------------------------------------------------------
def _mlp_fused_kernel(*refs, num_layers, activation, use_softmax):
    x_ref = refs[0]
    o_ref = refs[-1]
    layer_refs = refs[1:-1]

    h = x_ref[...]  # already bf16
    for i in range(num_layers):
        w_ref = layer_refs[2 * i]
        b_ref = layer_refs[2 * i + 1]
        # bf16 x bf16 -> f32 accumulation on the MXU
        y = jnp.dot(h, w_ref[...], preferred_element_type=jnp.float32)
        y = y + b_ref[...]  # (1, out_pad) broadcasts over the batch tile

        if i < num_layers - 1:
            if activation == "relu":
                y = jnp.maximum(y, 0.0)
            elif activation == "tanh":
                y = jnp.tanh(y)
            elif activation == "sigmoid":
                y = jax.nn.sigmoid(y)
            else:
                raise ValueError(f"unknown activation: {activation}")
            h = y.astype(jnp.bfloat16)
        else:
            if use_softmax:
                # Padded logit columns already hold -1e30 (baked into the bias),
                # so they vanish under exp(); no in-kernel masking needed.
                y = y - jnp.max(y, axis=1, keepdims=True)
                e = jnp.exp(y)
                # Exact reciprocal: one column per tile, and it guarantees rows
                # sum to 1 (approx=True broke that invariant previously).
                y = e / jnp.sum(e, axis=1, keepdims=True)
            o_ref[...] = y.astype(o_ref.dtype)


# ---------------------------------------------------------------------------
# MLP wrapper (mirrors the PyTorch module's forward semantics)
# ---------------------------------------------------------------------------
class MLPPallas:
    def __init__(self, input_size, hidden_sizes, output_size,
                 task_type="classification", activation="relu", key=None):
        if activation not in ("relu", "tanh", "sigmoid"):
            raise ValueError(f"unknown activation: {activation}")
        self.task_type = task_type
        self.activation = activation
        self.input_size = input_size
        self.output_size = output_size
        self.use_softmax = (task_type == "classification" and output_size > 1)

        if key is None:
            key = jax.random.PRNGKey(0)

        sizes = [input_size] + list(hidden_sizes) + [output_size]
        padded = [_round_up(s, 128) for s in sizes]
        self.padded_sizes = padded
        self.in_pad = padded[0]
        self.out_pad = padded[-1]

        self.params = []         # unpadded (for the pure-JAX reference)
        self.padded_params = []  # zero-padded bf16 weights / f32 biases (kernel)
        num_layers = len(sizes) - 1
        for i in range(num_layers):
            key, wk, bk = jax.random.split(key, 3)
            fan_in, fan_out = sizes[i], sizes[i + 1]
            bound = 1.0 / jnp.sqrt(fan_in)
            # weight stored as (in, out) -- see layout comment above
            w = jax.random.uniform(wk, (fan_in, fan_out), jnp.float32,
                                   minval=-bound, maxval=bound)
            b = jax.random.uniform(bk, (1, fan_out), jnp.float32,
                                   minval=-bound, maxval=bound)
            self.params.append((w, b))

            w_pad = jnp.zeros((padded[i], padded[i + 1]), jnp.bfloat16)
            w_pad = w_pad.at[:fan_in, :fan_out].set(w.astype(jnp.bfloat16))
            b_pad = jnp.zeros((1, padded[i + 1]), jnp.float32)
            b_pad = b_pad.at[:, :fan_out].set(b)
            if (i == num_layers - 1) and self.use_softmax and fan_out < padded[i + 1]:
                # Bake the softmax padding mask into the bias: padded weight
                # columns are zero, so padded logits become exactly -1e30.
                b_pad = b_pad.at[:, fan_out:].set(jnp.float32(-1e30))
            self.padded_params.append((w_pad, b_pad))

        self.num_layers = num_layers

    # -- VMEM budget derived from actual buffer sizes --------------------------
    def _vmem_limit_bytes(self, tm):
        # resident weights (single-buffered) + biases
        param_bytes = sum(int(w.size) * w.dtype.itemsize + int(b.size) * b.dtype.itemsize
                          for (w, b) in self.padded_params)
        # double-buffered input (bf16) and output (f32) tiles
        io_bytes = 2 * tm * self.in_pad * 2 + 2 * tm * self.out_pad * 4
        # transient f32 activations between layers
        act_bytes = sum(tm * p * 4 for p in self.padded_sizes[1:])
        need = int(1.3 * (param_bytes + io_bytes + act_bytes))
        # TODO(synk): on v7x (64 MiB/TC) very large models should switch to
        # per-layer weight streaming (pl.ANY + manual double-buffered DMA)
        # instead of fully-resident weights.
        return max(32 * 1024 * 1024, min(need, 100 * 1024 * 1024))

    # -- fused Pallas forward -------------------------------------------------
    def forward(self, x):
        batch = x.shape[0]
        tm = _pick_tm(batch)
        padded_batch = _round_up(batch, tm)

        # Feed bf16 directly: halves x's HBM->VMEM DMA bytes and VMEM footprint.
        x_pad = jnp.zeros((padded_batch, self.in_pad), jnp.bfloat16)
        x_pad = x_pad.at[:batch, :self.input_size].set(x.astype(jnp.bfloat16))

        flat_params = []
        in_specs = [pl.BlockSpec((tm, self.in_pad), lambda i: (i, 0))]
        for (w, b) in self.padded_params:
            flat_params.extend([w, b])
            in_specs.append(_resident_spec(w.shape))
            in_specs.append(_resident_spec(b.shape))
        out_specs = pl.BlockSpec((tm, self.out_pad), lambda i: (i, 0))

        kernel = functools.partial(
            _mlp_fused_kernel,
            num_layers=self.num_layers,
            activation=self.activation,
            use_softmax=self.use_softmax,
        )

        y = pl.pallas_call(
            kernel,
            out_shape=jax.ShapeDtypeStruct((padded_batch, self.out_pad),
                                           jnp.float32),
            grid=(padded_batch // tm,),
            in_specs=in_specs,
            out_specs=out_specs,
            compiler_params=pltpu.CompilerParams(
                # batch tiles are independent -> shard across TCs (megacore)
                dimension_semantics=("parallel",),
                vmem_limit_bytes=self._vmem_limit_bytes(tm),
            ),
        )(x_pad, *flat_params)

        return y[:batch, :self.output_size]

    def __call__(self, x):
        return self.forward(x)

    # -- pure-JAX reference (matches the kernel's bf16-matmul numerics) -------
    def reference(self, x):
        h = x.astype(jnp.float32)
        for i, (w, b) in enumerate(self.params):
            y = jnp.dot(h.astype(jnp.bfloat16), w.astype(jnp.bfloat16),
                        preferred_element_type=jnp.float32) + b
            if i < self.num_layers - 1:
                if self.activation == "relu":
                    y = jnp.maximum(y, 0.0)
                elif self.activation == "tanh":
                    y = jnp.tanh(y)
                elif self.activation == "sigmoid":
                    y = jax.nn.sigmoid(y)
                h = y
            else:
                if self.use_softmax:
                    return jax.nn.softmax(y, axis=1)
                return y


if __name__ == "__main__":
    key = jax.random.PRNGKey(0)
    key, xkey, pkey = jax.random.split(key, 3)

    batch = 2
    input_size = 16
    hidden_sizes = [32, 32]
    output_size = 4

    x = jax.random.normal(xkey, (batch, input_size), jnp.float32)

    # classification path (softmax epilogue)
    mlp = MLPPallas(input_size, hidden_sizes, output_size,
                    task_type="classification", activation="relu", key=pkey)
    out = jax.block_until_ready(mlp(x))
    ref = mlp.reference(x)
    assert out.shape == (batch, output_size)
    assert jnp.allclose(out, ref, atol=1e-3, rtol=1e-3), (out, ref)
    assert jnp.allclose(jnp.sum(out, axis=1), 1.0, atol=1e-3), jnp.sum(out, axis=1)

    # regression path (no softmax)
    mlp_reg = MLPPallas(input_size, hidden_sizes, 1,
                        task_type="regression", activation="tanh", key=pkey)
    out_reg = jax.block_until_ready(mlp_reg(x))
    ref_reg = mlp_reg.reference(x)
    assert out_reg.shape == (batch, 1)
    assert jnp.allclose(out_reg, ref_reg, atol=1e-3, rtol=1e-3), (out_reg, ref_reg)

    print("KERNEL_OK")
</pallas_src>

<mosaic_0001>
module attributes {stable_mosaic.version = 11 : i64} {
  func.func @_mlp_fused_kernel(%arg0: i32, %arg1: memref<16x128xbf16, #tpu.memory_space<vmem>>, %arg2: memref<128x128xbf16, #tpu.memory_space<vmem>>, %arg3: memref<1x128xf32, #tpu.memory_space<vmem>>, %arg4: memref<128x128xbf16, #tpu.memory_space<vmem>>, %arg5: memref<1x128xf32, #tpu.memory_space<vmem>>, %arg6: memref<128x128xbf16, #tpu.memory_space<vmem>>, %arg7: memref<1x128xf32, #tpu.memory_space<vmem>>, %arg8: memref<16x128xf32, #tpu.memory_space<vmem>>) attributes {dimension_semantics = [#tpu.dimension_semantics<parallel>], iteration_bounds = array<i64: 1>, scalar_prefetch = 0 : i64, scratch_operands = 0 : i64, tpu.core_type = #tpu.core_type<tc>, window_params = [{transform_indices = @transform_0, window_bounds = array<i64: 16, 128>}, {pipeline_mode = #tpu.pipeline_mode<synchronous>, transform_indices = @transform_1, window_bounds = array<i64: 128, 128>}, {pipeline_mode = #tpu.pipeline_mode<synchronous>, transform_indices = @transform_2, window_bounds = array<i64: 1, 128>}, {pipeline_mode = #tpu.pipeline_mode<synchronous>, transform_indices = @transform_3, window_bounds = array<i64: 128, 128>}, {pipeline_mode = #tpu.pipeline_mode<synchronous>, transform_indices = @transform_4, window_bounds = array<i64: 1, 128>}, {pipeline_mode = #tpu.pipeline_mode<synchronous>, transform_indices = @transform_5, window_bounds = array<i64: 128, 128>}, {pipeline_mode = #tpu.pipeline_mode<synchronous>, transform_indices = @transform_6, window_bounds = array<i64: 1, 128>}, {transform_indices = @transform_7, window_bounds = array<i64: 16, 128>}]} {
    %c0 = arith.constant 0 : index
    %c0_0 = arith.constant 0 : index
    %0 = vector.load %arg1[%c0, %c0_0] : memref<16x128xbf16, #tpu.memory_space<vmem>>, vector<16x128xbf16>
    %c0_1 = arith.constant 0 : index
    %c0_2 = arith.constant 0 : index
    %1 = vector.load %arg2[%c0_1, %c0_2] : memref<128x128xbf16, #tpu.memory_space<vmem>>, vector<128x128xbf16>
    %cst = arith.constant dense<0.000000e+00> : vector<16x128xf32>
    %2 = tpu.matmul %0, %1, %cst {dimension_numbers = #tpu.dot_dimension_numbers<[1], [0], [0], [1], [0, 0, 1, 1], [], []>} : vector<16x128xbf16>, vector<128x128xbf16>, vector<16x128xf32> -> vector<16x128xf32>
    %c0_3 = arith.constant 0 : index
    %c0_4 = arith.constant 0 : index
    %3 = vector.load %arg3[%c0_3, %c0_4] : memref<1x128xf32, #tpu.memory_space<vmem>>, vector<1x128xf32>
    %4 = vector.broadcast %3 : vector<1x128xf32> to vector<16x128xf32>
    %5 = arith.addf %2, %4 : vector<16x128xf32>
    %cst_5 = arith.constant 0.000000e+00 : f32
    %6 = vector.broadcast %cst_5 : f32 to vector<16x128xf32>
    %7 = arith.maximumf %5, %6 : vector<16x128xf32>
    %8 = arith.truncf %7 : vector<16x128xf32> to vector<16x128xbf16>
    %c0_6 = arith.constant 0 : index
    %c0_7 = arith.constant 0 : index
    %9 = vector.load %arg4[%c0_6, %c0_7] : memref<128x128xbf16, #tpu.memory_space<vmem>>, vector<128x128xbf16>
    %cst_8 = arith.constant dense<0.000000e+00> : vector<16x128xf32>
    %10 = tpu.matmul %8, %9, %cst_8 {dimension_numbers = #tpu.dot_dimension_numbers<[1], [0], [0], [1], [0, 0, 1, 1], [], []>} : vector<16x128xbf16>, vector<128x128xbf16>, vector<16x128xf32> -> vector<16x128xf32>
    %c0_9 = arith.constant 0 : index
    %c0_10 = arith.constant 0 : index
    %11 = vector.load %arg5[%c0_9, %c0_10] : memref<1x128xf32, #tpu.memory_space<vmem>>, vector<1x128xf32>
    %12 = vector.broadcast %11 : vector<1x128xf32> to vector<16x128xf32>
    %13 = arith.addf %10, %12 : vector<16x128xf32>
    %cst_11 = arith.constant 0.000000e+00 : f32
    %14 = vector.broadcast %cst_11 : f32 to vector<16x128xf32>
    %15 = arith.maximumf %13, %14 : vector<16x128xf32>
    %16 = arith.truncf %15 : vector<16x128xf32> to vector<16x128xbf16>
    %c0_12 = arith.constant 0 : index
    %c0_13 = arith.constant 0 : index
    %17 = vector.load %arg6[%c0_12, %c0_13] : memref<128x128xbf16, #tpu.memory_space<vmem>>, vector<128x128xbf16>
    %cst_14 = arith.constant dense<0.000000e+00> : vector<16x128xf32>
    %18 = tpu.matmul %16, %17, %cst_14 {dimension_numbers = #tpu.dot_dimension_numbers<[1], [0], [0], [1], [0, 0, 1, 1], [], []>} : vector<16x128xbf16>, vector<128x128xbf16>, vector<16x128xf32> -> vector<16x128xf32>
    %c0_15 = arith.constant 0 : index
    %c0_16 = arith.constant 0 : index
    %19 = vector.load %arg7[%c0_15, %c0_16] : memref<1x128xf32, #tpu.memory_space<vmem>>, vector<1x128xf32>
    %20 = vector.broadcast %19 : vector<1x128xf32> to vector<16x128xf32>
    %21 = arith.addf %18, %20 : vector<16x128xf32>
    %cst_17 = arith.constant dense<0xFF800000> : vector<16xf32>
    %22 = vector.multi_reduction <maximumf>, %21, %cst_17 [1] : vector<16x128xf32> to vector<16xf32>
    %23 = vector.shape_cast %22 : vector<16xf32> to vector<16x1xf32>
    %24 = vector.broadcast %23 : vector<16x1xf32> to vector<16x128xf32>
    %25 = arith.subf %21, %24 : vector<16x128xf32>
    %26 = math.exp %25 : vector<16x128xf32>
    %cst_18 = arith.constant dense<0.000000e+00> : vector<16xf32>
    %27 = vector.multi_reduction <add>, %26, %cst_18 [1] : vector<16x128xf32> to vector<16xf32>
    %28 = vector.shape_cast %27 : vector<16xf32> to vector<16x1xf32>
    %29 = vector.broadcast %28 : vector<16x1xf32> to vector<16x128xf32>
    %30 = arith.divf %26, %29 : vector<16x128xf32>
    %c0_19 = arith.constant 0 : index
    %c0_20 = arith.constant 0 : index
    %31 = vector.load %arg8[%c0_19, %c0_20] : memref<16x128xf32, #tpu.memory_space<vmem>>, vector<16x128xf32>
    tpu.vector_store %arg8[%c0_19, %c0_20], %30 {strides = array<i32>} : memref<16x128xf32, #tpu.memory_space<vmem>>, vector<16x128xf32>,
    return
  }
  func.func @transform_0(%arg0: i32) -> (i32, i32) {
    %c0_i32 = arith.constant 0 : i32
    %c0_i32_0 = arith.constant 0 : i32
    return %arg0, %c0_i32 : i32, i32
  }
  func.func @transform_1(%arg0: i32) -> (i32, i32) {
    %c0_i32 = arith.constant 0 : i32
    %c0_i32_0 = arith.constant 0 : i32
    %c0_i32_1 = arith.constant 0 : i32
    return %c0_i32, %c0_i32_0 : i32, i32
  }
  func.func @transform_2(%arg0: i32) -> (i32, i32) {
    %c0_i32 = arith.constant 0 : i32
    %c0_i32_0 = arith.constant 0 : i32
    %c0_i32_1 = arith.constant 0 : i32
    return %c0_i32, %c0_i32_0 : i32, i32
  }
  func.func @transform_3(%arg0: i32) -> (i32, i32) {
    %c0_i32 = arith.constant 0 : i32
    %c0_i32_0 = arith.constant 0 : i32
    %c0_i32_1 = arith.constant 0 : i32
    return %c0_i32, %c0_i32_0 : i32, i32
  }
  func.func @transform_4(%arg0: i32) -> (i32, i32) {
    %c0_i32 = arith.constant 0 : i32
    %c0_i32_0 = arith.constant 0 : i32
    %c0_i32_1 = arith.constant 0 : i32
    return %c0_i32, %c0_i32_0 : i32, i32
  }
  func.func @transform_5(%arg0: i32) -> (i32, i32) {
    %c0_i32 = arith.constant 0 : i32
    %c0_i32_0 = arith.constant 0 : i32
    %c0_i32_1 = arith.constant 0 : i32
    return %c0_i32, %c0_i32_0 : i32, i32
  }
  func.func @transform_6(%arg0: i32) -> (i32, i32) {
    %c0_i32 = arith.constant 0 : i32
    %c0_i32_0 = arith.constant 0 : i32
    %c0_i32_1 = arith.constant 0 : i32
    return %c0_i32, %c0_i32_0 : i32, i32
  }
  func.func @transform_7(%arg0: i32) -> (i32, i32) {
    %c0_i32 = arith.constant 0 : i32
    %c0_i32_0 = arith.constant 0 : i32
    return %arg0, %c0_i32 : i32, i32
  }
}

</mosaic_0001>

<bundles_post_ra>
// kernel: tpu_custom_call.1
= control target key start
LH: loop header
LB: loop body
LE: loop exit
PB: predicated region body
PF: predicated region fallthrough
CT: control target
= control target key end

     0   :  { %12 = vsyncpa [#allocation3], 0  ;;  %s856_s0 = inlined_call_operand.hbm [shape: bf16[16,128], index: 0, kind: input, shape index: {}]   ;;  %s857_s1 = inlined_call_operand.hbm [shape: bf16[128,128], index: 1, kind: input, shape index: {}]   ;;  %s858_s2 = inlined_call_operand.vmem [shape: f32[1,128], index: 2, kind: input, shape index: {}]   ;;  %s859_s3 = inlined_call_operand.hbm [shape: bf16[128,128], index: 3, kind: input, shape index: {}]   ;;  %s860_s4 = inlined_call_operand.vmem [shape: f32[1,128], index: 4, kind: input, shape index: {}]   ;;  %s861_s5 = inlined_call_operand.hbm [shape: bf16[128,128], index: 5, kind: input, shape index: {}]   ;;  %s862_s6 = inlined_call_operand.vmem [shape: f32[1,128], index: 6, kind: input, shape index: {}]   ;;  %s863_s7 = inlined_call_operand.hbm [shape: f32[16,128], index: 7, kind: output, shape index: {}]  }
   0x1   :  { %13 = vsyncpa [#allocation6], 0 }
   0x2   :  { %14 = vsyncpa [#allocation9], 0 }
   0x3   :  { %15 = vsyncpa [#allocation4], 0  ;;  %s739_s24 = smov [#allocation5]   ;;  %s740_s26 = smov [#allocation2]  }
   0x4   :  { %s33_s25 = sshll.u32 %s739_s24, 4  ;;  %s21_s27 = sshll.u32 %s740_s26, 4  ;;  %s34_s25 = int_to_ptr.vmem [resolvable:$true] %s33_s25  ;;  %s22_s27 = int_to_ptr.vmem [resolvable:$true] %s21_s27 }
   0x5   :  { %s639_s28 = scalar_lea.vmem %s34_s25, 1024  ;;  %p644_p1 = scmp.lt.s32.totalorder %s34_s25, %s34_s25 }
   0x6   :  { %p640_p0 = scmp.ne.s32.totalorder %s34_s25, %s639_s28  ;;  %p645_p2 = scmp.lt.s32.totalorder %s639_s28, %s639_s28 }
   0x8   :  { %p646_p3 = por %p645_p2, %p644_p1 }
   0xa   :  { %p647_p4 = pnand %p646_p3, %p640_p0 }
   0xc   :  { %650 = shalt.err (!%p647_p4)
}
   0xd   :  { %s741_s29 = smov 64   ;;  %s742_s30 = smov 4  }
   0xe   :  { %39 = dma.hbm_to_vmem [thread:$0]  %s857_s1, 1024, %s34_s25, [#allocation6], %s741_s29, %s741_s29, %s742_s30  }
   0xf   :  { %s659_s10 = scalar_lea.vmem %s22_s27, 128  ;;  %p664_p6 = scmp.lt.s32.totalorder %s22_s27, %s22_s27 }
  0x10   :  { %p660_p5 = scmp.ne.s32.totalorder %s22_s27, %s659_s10  ;;  %p665_p7 = scmp.lt.s32.totalorder %s659_s10, %s659_s10 }
  0x12   :  { %p666_p8 = por %p665_p7, %p664_p6 }
  0x14   :  { %p667_p9 = pnand %p666_p8, %p660_p5 }
  0x16   :  { %670 = shalt.err (!%p667_p9)
}
  0x17   :  { %27 = dma.hbm_to_vmem [thread:$0]  %s856_s0, 128, %s22_s27, [#allocation3], %s741_s29, %s741_s29, %s742_s30  }
  0x18   :  { %s743_s13 = smov [#allocation7]   ;;  %s744_s15 = smov [#allocation8]  }
  0x19   :  { %s47_s14 = sshll.u32 %s743_s13, 4  ;;  %s61_s16 = sshll.u32 %s744_s15, 4  ;;  %s48_s14 = int_to_ptr.vmem [resolvable:$true] %s47_s14  ;;  %s62_s16 = int_to_ptr.vmem [resolvable:$true] %s61_s16 }
  0x1a   :  { %s679_s1 = scalar_lea.vmem %s48_s14, 1024  ;;  %p684_p11 = scmp.lt.s32.totalorder %s48_s14, %s48_s14 }
  0x1b   :  { %p680_p10 = scmp.ne.s32.totalorder %s48_s14, %s679_s1  ;;  %p685_p12 = scmp.lt.s32.totalorder %s679_s1, %s679_s1 }
  0x1d   :  { %p686_p13 = por %p685_p12, %p684_p11 }
  0x1f   :  { %p687_p0 = pnand %p686_p13, %p680_p10 }
  0x21   :  { %690 = shalt.err (!%p687_p0)
}
  0x22   :  { %53 = dma.hbm_to_vmem [thread:$0]  %s859_s3, 1024, %s48_s14, [#allocation6], %s741_s29, %s741_s29, %s742_s30  }
  0x23   :  { %s699_s0 = scalar_lea.vmem %s62_s16, 1024  ;;  %p704_p2 = scmp.lt.s32.totalorder %s62_s16, %s62_s16 }
  0x24   :  { %p700_p1 = scmp.ne.s32.totalorder %s62_s16, %s699_s0  ;;  %p705_p3 = scmp.lt.s32.totalorder %s699_s0, %s699_s0 }
  0x26   :  { %p706_p4 = por %p705_p3, %p704_p2 }
  0x28   :  { %p707_p5 = pnand %p706_p4, %p700_p1 }
  0x2a   :  { %710 = shalt.err (!%p707_p5)
}
  0x2b   :  { %67 = dma.hbm_to_vmem [thread:$0]  %s861_s5, 1024, %s62_s16, [#allocation9], %s741_s29, %s741_s29, %s742_s30  }
  0x2c   :  { %731 = dma.done.wait [#allocation3], 128  }
  0x2d   :  { %732 = vsyncadd [#allocation3], 4294967168 }
  0x2e   :  { %733 = dma.done.wait [#allocation6], 2048  }
  0x2f   :  { %734 = vsyncadd [#allocation6], 4294965248 }
  0x30   :  { %735 = dma.done.wait [#allocation9], 1024  }
  0x31   :  { %736 = vsyncadd [#allocation9], 4294966272  ;;  %v745_v0 = vmov 0.0   ;;  %vm746_vm0 = vmmov 0   ;;  %v598_v1 = vld [vmem:[#allocation5 + $0x38] sm:$0xff]   ;;  %v599_v2 = vld [vmem:[#allocation5 + $0x30] sm:$0xff]  }
  0x32   :  { %527 = vmatprep.subr.bf16.mxu0 %v745_v0  ;;  %543 = vmatprep.mubr.msk.bf16.mxu0 %vm746_vm0, %v745_v0  ;;  %v600_v3 = vld [vmem:[#allocation5 + $0x28] sm:$0xff]   ;;  %v607_v4 = vld [vmem:[#allocation7 + $0x38] sm:$0xff]   ;;  %v601_v5 = vld [vmem:[#allocation5 + $0x20] sm:$0xff]  }
  0x33   :  { %547 = vmatprep.subr.bf16.mxu1 %v745_v0  ;;  %563 = vmatprep.mubr.msk.bf16.mxu1 %vm746_vm0, %v745_v0  ;;  %v608_v6 = vld [vmem:[#allocation7 + $0x30] sm:$0xff]   ;;  %v602_v7 = vld [vmem:[#allocation5 + $0x18] sm:$0xff]   ;;  %v609_v8 = vld [vmem:[#allocation7 + $0x28] sm:$0xff]  }
  0x34   :  { %528 = vmatpush3.bf16.msra.mxu0 %v598_v1  ;;  %548 = vmatpush3.bf16.msra.mxu1 %v607_v4  ;;  %v603_v9 = vld [vmem:[#allocation5 + $0x10] sm:$0xff]   ;;  %v610_v10 = vld [vmem:[#allocation7 + $0x20] sm:$0xff]   ;;  %v604_v11 = vld [vmem:[#allocation5 + $0x8] sm:$0xff]  }
  0x35   :  { %529 = vmatprep.subr.bf16.mxu0 %v745_v0  ;;  %549 = vmatprep.subr.bf16.mxu1 %v745_v0  ;;  %v611_v12 = vld [vmem:[#allocation7 + $0x18] sm:$0xff]   ;;  %v605_v13 = vld [vmem:[#allocation5] sm:$0xff]   ;;  %v612_v15 = vld [vmem:[#allocation7 + $0x10] sm:$0xff]  }
  0x36   :  { %v606_v14 = vld [vmem:[#allocation2] sm:$0xff]   ;;  %v613_v16 = vld [vmem:[#allocation7 + $0x8] sm:$0xff]   ;;  %v614_v17 = vld [vmem:[#allocation7] sm:$0xff]  }
  0x37   :  { %v615_v18 = vld [vmem:[#allocation8 + $0x38] sm:$0xff]   ;;  %v616_v19 = vld [vmem:[#allocation8 + $0x30] sm:$0xff]   ;;  %v617_v20 = vld [vmem:[#allocation8 + $0x28] sm:$0xff]  }
  0x38   :  { %530 = vmatpush3.bf16.msra.mxu0 %v599_v2  ;;  %550 = vmatpush3.bf16.msra.mxu1 %v608_v6  ;;  %v618_v21 = vld [vmem:[#allocation8 + $0x20] sm:$0xff]   ;;  %v619_v22 = vld [vmem:[#allocation8 + $0x18] sm:$0xff]   ;;  %v620_v33 = vld [vmem:[#allocation8 + $0x10] sm:$0xff]  }
  0x39   :  { %531 = vmatprep.subr.bf16.mxu0 %v745_v0  ;;  %551 = vmatprep.subr.bf16.mxu1 %v745_v0  ;;  %v472_v23 = vld [vmem:[%s858_s2] ss:$0 sm:$0xff]  ;;  %v621_v34 = vld [vmem:[#allocation8 + $0x8] sm:$0xff]   ;;  %v622_v35 = vld [vmem:[#allocation8] sm:$0xff]  }
  0x3a   :  { %v482_v36 = vld [vmem:[%s860_s4] ss:$0 sm:$0xff]  ;;  %s747_s4 = smov [#allocation10]  }
  0x3b   :  { %v491_v46 = vld [vmem:[%s862_s6] ss:$0 sm:$0xff]  ;;  %s458_s6 = sshll.u32 %s747_s4, 4  ;;  %s459_s6 = int_to_ptr.vmem [resolvable:$true] %s458_s6 }
  0x3c   :  { %532 = vmatpush3.bf16.msra.mxu0 %v600_v3  ;;  %552 = vmatpush3.bf16.msra.mxu1 %v609_v8  ;;  %s711_s24 = scalar_lea.vmem %s459_s6, 256  ;;  %p716_p7 = scmp.lt.s32.totalorder %s459_s6, %s459_s6 }
  0x3d   :  { %533 = vmatprep.subr.bf16.mxu0 %v745_v0  ;;  %553 = vmatprep.subr.bf16.mxu1 %v745_v0  ;;  %p712_p6 = scmp.ne.s32.totalorder %s459_s6, %s711_s24  ;;  %p717_p8 = scmp.lt.s32.totalorder %s711_s24, %s711_s24 }
  0x3f   :  { %p718_p9 = por %p717_p8, %p716_p7 }
  0x40   :  { %534 = vmatpush3.bf16.msra.mxu0 %v601_v5  ;;  %554 = vmatpush3.bf16.msra.mxu1 %v610_v10 }
  0x41   :  { %535 = vmatprep.subr.bf16.mxu0 %v745_v0  ;;  %555 = vmatprep.subr.bf16.mxu1 %v745_v0  ;;  %p719_p10 = pnand %p718_p9, %p712_p6 }
  0x44   :  { %536 = vmatpush3.bf16.msra.mxu0 %v602_v7  ;;  %556 = vmatpush3.bf16.msra.mxu1 %v611_v12 }
  0x45   :  { %537 = vmatprep.subr.bf16.mxu0 %v745_v0  ;;  %557 = vmatprep.subr.bf16.mxu1 %v745_v0 }
  0x48   :  { %538 = vmatpush3.bf16.msra.mxu0 %v603_v9  ;;  %558 = vmatpush3.bf16.msra.mxu1 %v612_v15 }
  0x49   :  { %539 = vmatprep.subr.bf16.mxu0 %v745_v0  ;;  %559 = vmatprep.subr.bf16.mxu1 %v745_v0 }
  0x4c   :  { %540 = vmatpush3.bf16.msra.mxu0 %v604_v11  ;;  %560 = vmatpush3.bf16.msra.mxu1 %v613_v16 }
  0x4d   :  { %541 = vmatprep.subr.bf16.mxu0 %v745_v0  ;;  %561 = vmatprep.subr.bf16.mxu1 %v745_v0 }
  0x50   :  { %542 = vmatpush3.bf16.msra.mxu0 %v605_v13  ;;  %562 = vmatpush3.bf16.msra.mxu1 %v614_v17 }
  0x51   :  { %567 = vmatprep.subr.bf16.mxu0 %v745_v0 }
  0x53   :  { %544 = vmatmul.mubr.bf16.vlgmr.msra.gmra.mxu0 %v606_v14 }
  0x54   :  { %583 = vmatprep.mubr.msk.bf16.mxu0 %vm746_vm0, %v745_v0  ;;  %568 = vmatpush3.bf16.msra.mxu0 %v615_v18 }
  0x55   :  { %569 = vmatprep.subr.bf16.mxu0 %v745_v0 }
  0x58   :  { %570 = vmatpush3.bf16.msra.mxu0 %v616_v19 }
  0x59   :  { %571 = vmatprep.subr.bf16.mxu0 %v745_v0 }
  0x5c   :  { %572 = vmatpush3.bf16.msra.mxu0 %v617_v20 }
  0x5d   :  { %573 = vmatprep.subr.bf16.mxu0 %v745_v0 }
  0x60   :  { %574 = vmatpush3.bf16.msra.mxu0 %v618_v21 }
  0x61   :  { %575 = vmatprep.subr.bf16.mxu0 %v745_v0 }
  0x64   :  { %576 = vmatpush3.bf16.msra.mxu0 %v619_v22 }
  0x65   :  { %577 = vmatprep.subr.bf16.mxu0 %v745_v0 }
  0x68   :  { %578 = vmatpush3.bf16.msra.mxu0 %v620_v33 }
  0x69   :  { %579 = vmatprep.subr.bf16.mxu0 %v745_v0 }
  0x6c   :  { %580 = vmatpush3.bf16.msra.mxu0 %v621_v34 }
  0x6d   :  { %581 = vmatprep.subr.bf16.mxu0 %v745_v0 }
  0x70   :  { %582 = vmatpush3.bf16.msra.mxu0 %v622_v35 }
 0x113   :  { %v196_v24 = vpop.f32.mrf.mxu0 }
 0x114   :  { %v197_v26 = vadd.f32 %v472_v23, %v196_v24 }
 0x115   :  { %v545_v25 = vpop.f32.mrf.mxu0 }
 0x116   :  { %v203_v30 = vmax.f32 %v197_v26, 0.0 }
 0x117   :  { %v199_v27 = vpop.f32.mrf.mxu0 }
 0x118   :  { %v200_v28 = vadd.f32 %v472_v23, %v199_v27 }
 0x119   :  { %v546_v29 = vpop.f32.mrf.mxu0 }
 0x11a   :  { %v204_v31 = vmax.f32 %v200_v28, 0.0 }
 0x11c   :  { %v205_v32 = vpack.c.bf16 %v204_v31, %v203_v30 }
 0x11e   :  { %564 = vmatmul.mubr.bf16.vlgmr.msra.gmra.mxu1 %v205_v32 }
 0x1de   :  { %v311_v37 = vpop.f32.mrf.mxu1 }
 0x1df   :  { %v312_v39 = vadd.f32 %v482_v36, %v311_v37 }
 0x1e0   :  { %v565_v38 = vpop.f32.mrf.mxu1 }
 0x1e1   :  { %v318_v43 = vmax.f32 %v312_v39, 0.0 }
 0x1e2   :  { %v314_v40 = vpop.f32.mrf.mxu1 }
 0x1e3   :  { %v315_v41 = vadd.f32 %v482_v36, %v314_v40 }
 0x1e4   :  { %v566_v42 = vpop.f32.mrf.mxu1 }
 0x1e5   :  { %v319_v44 = vmax.f32 %v315_v41, 0.0 }
 0x1e7   :  { %v320_v45 = vpack.c.bf16 %v319_v44, %v318_v43 }
 0x1e9   :  { %584 = vmatmul.mubr.bf16.vlgmr.msra.gmra.mxu0 %v320_v45 }
 0x2a9   :  { %v426_v47 = vpop.f32.mrf.mxu0 }
 0x2aa   :  { %v427_v48 = vadd.f32 %v491_v46, %v426_v47 }
 0x2ab   :  { %v585_v49 = vpop.f32.mrf.mxu0 }
 0x2ac   :  { %433 = vmax.xlane.f32.xlu0 %v427_v48 }
 0x2ad   :  { %v429_v50 = vpop.f32.mrf.mxu0 }
 0x2ae   :  { %v430_v51 = vadd.f32 %v491_v46, %v429_v50 }
 0x2af   :  { %v586_v52 = vpop.f32.mrf.mxu0 }
 0x2b0   :  { %435 = vmax.xlane.f32.xlu0 %v430_v51 }
 0x335   :  { %v434_v53 = vpop.xlane.xlu0 %433 }
 0x336   :  { %v437_v54 = vsub.f32 %v427_v48, %v434_v53 }
 0x338   :  { %v439_v55 = vmul.f32 1.442695, %v437_v54 }
 0x339   :  { %v436_v56 = vpop.xlane.xlu0 %435 }
 0x33a   :  { %623 = vpow2.f32 %v439_v55  ;;  %v438_v57 = vsub.f32 %v430_v51, %v436_v56 }
 0x33c   :  { %v441_v58 = vmul.f32 1.442695, %v438_v57 }
 0x33e   :  { %625 = vpow2.f32 %v441_v58 }
 0x347   :  { %v624_v59 = vpop.eup %623 }
 0x348   :  { %443 = vadd.xlane.f32.xlu1 %v624_v59 }
 0x34b   :  { %v626_v60 = vpop.eup %625 }
 0x34c   :  { %445 = vadd.xlane.f32.xlu1 %v626_v60 }
 0x3d1   :  { %v444_v61 = vpop.xlane.xlu1 %443 }
 0x3d2   :  { %627 = vrcp.f32 %v444_v61 }
 0x3d5   :  { %v446_v62 = vpop.xlane.xlu1 %445 }
 0x3d6   :  { %629 = vrcp.f32 %v446_v62 }
 0x3df   :  { %v628_v63 = vpop.eup %627 }
 0x3e0   :  { %v448_v0 = vmul.f32 %v628_v63, %v624_v59 }
 0x3e2   :  { %451 = vst [vmem:[#allocation10] sm:$0xff] %v448_v0 }
 0x3e3   :  { %v630_v1 = vpop.eup %629 }
 0x3e4   :  { %v450_v2 = vmul.f32 %v630_v1, %v626_v60 }
 0x3e6   :  { %452 = vst [vmem:[#allocation10 + $0x8] sm:$0xff] %v450_v2 }
 0x3e7   :  { %722 = shalt.err (!%p719_p10)
}
 0x3e8   :  { %s748_s25 = smov 128   ;;  %s749_s26 = smov 8  }
 0x3e9   :  { %464 = dma.vmem_to_hbm [thread:$0]  %s459_s6, 256, %s863_s7, [#allocation4], %s748_s25, %s748_s25, %s749_s26  }
 0x3ea   :  { %737 = dma.done.wait [#allocation4], 256  }
 0x3eb   :  { %738 = vsyncadd [#allocation4], 4294967040 }
 0x3ec   :  { %468 = vsyncpa [#allocation3], 1 }
 0x3ed   :  { %469 = vsyncpa [#allocation6], 1 }
 0x3ee   :  { %470 = vsyncpa [#allocation9], 1 }
 0x3ef   :  { %471 = vsyncpa [#allocation4], 1 }

</bundles_post_ra>
